<compile_context>
chip_gen: v7x
topology: tpu7x:2x2x1
jax: 0.10.0
libtpu: 0.0.40
codegen_flags: <defaults>
</compile_context>

<pallas_src>
import functools

import jax
import jax.numpy as jnp
from jax.experimental import pallas as pl
from jax.experimental.pallas import tpu as pltpu


LANE = 128


def _head_finalize(pooled, w_ref, b_ref, o_ref):
    """pooled: (2, PT, C) f32.  SplitAndConcat + fused 3-head Linear:
    concat([left, right], axis=1) @ W == left @ W[:C] + right @ W[C:]."""
    w = w_ref[...]                                  # (2, C, 3*O)
    out = (jnp.dot(pooled[0], w[0], preferred_element_type=jnp.float32)
           + jnp.dot(pooled[1], w[1], preferred_element_type=jnp.float32)
           + b_ref[...])
    o_ref[...] = out.astype(o_ref.dtype)


def _head_kernel_single(x_ref, w_ref, b_ref, o_ref, *, inv_hw):
    """Single HW step: x_ref (2, PT, C, HW) holds the full spatial extent."""
    pooled = jnp.sum(x_ref[...].astype(jnp.float32), axis=-1) * jnp.float32(inv_hw)
    _head_finalize(pooled, w_ref, b_ref, o_ref)


def _head_kernel_tiled(x_ref, w_ref, b_ref, o_ref, acc_ref, *,
                       inv_hw, hw, hw_tile, need_mask):
    """Multi-step HW reduction.  x_ref: (2, PT, C, hw_tile);
    acc_ref: (2, PT, C, LANE) f32 scratch (cross-lane reduce deferred)."""
    k = pl.program_id(1)

    @pl.when(k == 0)
    def _():
        acc_ref[...] = jnp.zeros_like(acc_ref)

    # Hot loop: accumulate 128-lane chunks with pure element-wise (VALU) adds.
    acc = acc_ref[...]
    base = k * hw_tile
    for c in range(hw_tile // LANE):
        chunk = x_ref[:, :, :, c * LANE:(c + 1) * LANE].astype(jnp.float32)
        if need_mask:
            # Zero the out-of-range columns of the (OOB-padded) tail tile.
            pos = base + c * LANE + jax.lax.broadcasted_iota(
                jnp.int32, chunk.shape, 3)
            chunk = jnp.where(pos < hw, chunk, 0.0)
        acc = acc + chunk
    acc_ref[...] = acc

    @pl.when(k == pl.num_programs(1) - 1)
    def _():
        # Single cross-lane (XLU) reduce per pair block, then the tiny matmul.
        pooled = jnp.sum(acc_ref[...], axis=-1) * jnp.float32(inv_hw)
        _head_finalize(pooled, w_ref, b_ref, o_ref)


def _choose_pair_tile(n_pairs):
    """Smallest multiple-of-8 divisor of n_pairs that still leaves >= 2 blocks
    on the 'parallel' pair axis (so both v7x TensorCores can get work and the
    x block stays small); else the full extent (layout-legal: equals the full
    output sublane dim)."""
    for pt in range(8, n_pairs // 2 + 1, 8):
        if n_pairs % pt == 0:
            return pt
    return n_pairs


def social_eye_prediction_bound_head(x, params, *, hw_tile=None):
    """x: (B, C, H, W) NCHW.  Returns dict of (B//2, out_channels) arrays.
    hw_tile: optional override forcing the tiled-HW reduction path (testing)."""
    B, C, H, W = x.shape
    assert B % 2 == 0, "batch must be even (left/right eye pairs)"
    n_pairs = B // 2
    O = params["w_main"].shape[1]
    HW = H * W
    itemsize = x.dtype.itemsize

    # Fuse the three heads: W_all (2C, 3O) -> (2, C, 3O); bias (1, 3O).
    w_all = jnp.concatenate(
        [params["w_main"], params["w_upper"], params["w_lower"]], axis=1)
    w3 = w_all.reshape(2, C, 3 * O).astype(jnp.float32)
    b_all = jnp.concatenate(
        [params["b_main"], params["b_upper"], params["b_lower"]],
        axis=1).astype(jnp.float32)

    # (B, C, H, W) -> (2, B/2, C, HW): contiguous reshape, no copy, no pad.
    x_r = x.reshape(2, n_pairs, C, HW)

    # ---- per-generation tile sizing --------------------------------------
    try:
        vmem_bytes = int(pltpu.get_tpu_info().vmem_capacity_bytes)
    except Exception:  # conservative default: v7x per-TensorCore VMEM
        vmem_bytes = 64 << 20

    pt = _choose_pair_tile(n_pairs)
    # Per x-block budget (~4 MiB on v7x, ~8 MiB on v5e/v6e); BlockSpec
    # double-buffers, so ~2x this lands in VMEM.
    block_budget = max(vmem_bytes // 16, 1 << 20)
    row_bytes = 2 * pt * C * itemsize          # bytes per HW column per block

    force_tiled = hw_tile is not None
    if not force_tiled and row_bytes * HW <= block_budget:
        hw_tile = HW                            # full extent -> no pad, no mask
        single_step = True
    else:
        if hw_tile is None:
            hw_tile = (block_budget // row_bytes) // LANE * LANE
        hw_tile = int(max(LANE, (int(hw_tile) // LANE) * LANE))
        hw_tile = min(hw_tile, pl.cdiv(HW, LANE) * LANE)
        if hw_tile >= HW:                       # degenerate: fits in one tile
            hw_tile = HW
            single_step = True
        else:
            single_step = False

    grid_pairs = n_pairs // pt
    n_hw = pl.cdiv(HW, hw_tile)
    inv_hw = 1.0 / HW

    # Explicit scoped-VMEM budget (x blocks are double-buffered by BlockSpec).
    x_block_bytes = row_bytes * hw_tile
    resident_bytes = (w3.size + b_all.size + n_pairs * 3 * O) * 4
    acc_bytes = 0 if single_step else 2 * pt * C * LANE * 4
    vmem_limit = int(min(
        max(2 * x_block_bytes + 2 * resident_bytes + acc_bytes + (2 << 20),
            16 << 20),
        vmem_bytes * 3 // 4))

    cost = pl.CostEstimate(
        flops=int(x.size + 2 * n_pairs * (2 * C) * (3 * O)),
        transcendentals=0,
        bytes_accessed=int(x.size * itemsize + (w3.size + b_all.size) * 4
                           + n_pairs * 3 * O * 4),
    )

    common = dict(
        out_shape=jax.ShapeDtypeStruct((n_pairs, 3 * O), jnp.float32),
        cost_estimate=cost,
    )

    if single_step:
        out_all = pl.pallas_call(
            functools.partial(_head_kernel_single, inv_hw=inv_hw),
            grid_spec=pltpu.PrefetchScalarGridSpec(
                num_scalar_prefetch=0,
                grid=(grid_pairs,),
                in_specs=[
                    pl.BlockSpec((2, pt, C, HW), lambda p: (0, p, 0, 0)),
                    pl.BlockSpec((2, C, 3 * O), lambda p: (0, 0, 0)),   # resident
                    pl.BlockSpec((1, 3 * O), lambda p: (0, 0)),         # resident
                ],
                out_specs=pl.BlockSpec((pt, 3 * O), lambda p: (p, 0)),
            ),
            compiler_params=pltpu.CompilerParams(
                dimension_semantics=("parallel",),
                vmem_limit_bytes=vmem_limit,
            ),
            **common,
        )(x_r, w3, b_all)
    else:
        need_mask = (HW % hw_tile) != 0
        out_all = pl.pallas_call(
            functools.partial(_head_kernel_tiled, inv_hw=inv_hw, hw=HW,
                              hw_tile=hw_tile, need_mask=need_mask),
            grid_spec=pltpu.PrefetchScalarGridSpec(
                num_scalar_prefetch=0,
                grid=(grid_pairs, n_hw),
                in_specs=[
                    pl.BlockSpec((2, pt, C, hw_tile), lambda p, k: (0, p, 0, k)),
                    pl.BlockSpec((2, C, 3 * O), lambda p, k: (0, 0, 0)),   # resident
                    pl.BlockSpec((1, 3 * O), lambda p, k: (0, 0)),         # resident
                ],
                out_specs=pl.BlockSpec((pt, 3 * O), lambda p, k: (p, 0)),
                scratch_shapes=[pltpu.VMEM((2, pt, C, LANE), jnp.float32)],
            ),
            compiler_params=pltpu.CompilerParams(
                dimension_semantics=("parallel", "arbitrary"),
                vmem_limit_bytes=vmem_limit,
            ),
            **common,
        )(x_r, w3, b_all)

    return {"main": out_all[:, :O],
            "lower": out_all[:, 2 * O:],
            "upper": out_all[:, O:2 * O]}


def init_params(key, in_channels, out_channels):
    """Deterministic synthetic init (stands in for the module's init_weights)."""
    fan_in = 2 * in_channels  # * output_feature_dim (=1 for (1,1) pooling)
    ks = jax.random.split(key, 6)

    def lin(kw, kb):
        w = jax.random.normal(kw, (fan_in, out_channels), jnp.float32) * 0.02
        b = jax.random.normal(kb, (1, out_channels), jnp.float32) * 0.02
        return w, b

    w_main, b_main = lin(ks[0], ks[1])
    w_upper, b_upper = lin(ks[2], ks[3])
    w_lower, b_lower = lin(ks[4], ks[5])
    return {"w_main": w_main, "b_main": b_main,
            "w_upper": w_upper, "b_upper": b_upper,
            "w_lower": w_lower, "b_lower": b_lower}


def _reference(x, params):
    """Pure-JAX reference mirroring the PyTorch forward."""
    B = x.shape[0]
    pooled = jnp.mean(x, axis=(2, 3))                                  # avgpool (1,1)
    f = jnp.concatenate([pooled[: B // 2], pooled[B // 2:]], axis=1)   # split+concat

    def fc(w, b):
        return f @ w + b

    return {"main": fc(params["w_main"], params["b_main"]),
            "lower": fc(params["w_lower"], params["b_lower"]),
            "upper": fc(params["w_upper"], params["b_upper"])}


if __name__ == "__main__":
    key = jax.random.PRNGKey(0)
    kx, kp, kx2 = jax.random.split(key, 3)

    # Primary config: batch=2 (one left + one right eye), 4 channels, 16x16.
    # HW=256 fits in one block -> single-step path, no padding, no masking.
    B, C, H, W = 2, 4, 16, 16
    out_channels = 3
    x = jax.random.normal(kx, (B, C, H, W), jnp.float32)
    params = init_params(kp, C, out_channels)

    out = jax.block_until_ready(social_eye_prediction_bound_head(x, params))
    ref = _reference(x, params)
    for name in ("main", "lower", "upper"):
        assert out[name].shape == (B // 2, out_channels)
        assert jnp.allclose(out[name], ref[name], atol=1e-5, rtol=1e-5), name

    # Second config forces the multi-step HW reduction path (HW=320, 128-wide
    # tiles -> 3 reduction steps) and exercises the in-kernel tail masking.
    B2, C2, H2, W2 = 4, 4, 16, 20
    x2 = jax.random.normal(kx2, (B2, C2, H2, W2), jnp.float32)
    out2 = jax.block_until_ready(
        social_eye_prediction_bound_head(x2, params, hw_tile=128))
    ref2 = _reference(x2, params)
    for name in ("main", "lower", "upper"):
        assert out2[name].shape == (B2 // 2, out_channels)
        assert jnp.allclose(out2[name], ref2[name], atol=1e-5, rtol=1e-5), name

    print("KERNEL_OK")
</pallas_src>

<mosaic_0001>
module attributes {stable_mosaic.version = 11 : i64} {
  func.func @_head_kernel_single(%arg0: i32, %arg1: memref<2x1x4x256xf32, #tpu.memory_space<vmem>>, %arg2: memref<2x4x9xf32, #tpu.memory_space<vmem>>, %arg3: memref<1x9xf32, #tpu.memory_space<vmem>>, %arg4: memref<1x9xf32, #tpu.memory_space<vmem>>) attributes {dimension_semantics = [#tpu.dimension_semantics<parallel>], iteration_bounds = array<i64: 1>, scalar_prefetch = 0 : i64, scratch_operands = 0 : i64, tpu.core_type = #tpu.core_type<tc>, window_params = [{transform_indices = @transform_0, window_bounds = array<i64: 2, 1, 4, 256>}, {pipeline_mode = #tpu.pipeline_mode<synchronous>, transform_indices = @transform_1, window_bounds = array<i64: 2, 4, 9>}, {pipeline_mode = #tpu.pipeline_mode<synchronous>, transform_indices = @transform_2, window_bounds = array<i64: 1, 9>}, {transform_indices = @transform_3, window_bounds = array<i64: 1, 9>}]} {
    %c0 = arith.constant 0 : index
    %c0_0 = arith.constant 0 : index
    %c0_1 = arith.constant 0 : index
    %c0_2 = arith.constant 0 : index
    %0 = vector.load %arg1[%c0, %c0_0, %c0_1, %c0_2] : memref<2x1x4x256xf32, #tpu.memory_space<vmem>>, vector<2x1x4x256xf32>
    %cst = arith.constant dense<0.000000e+00> : vector<2x1x4xf32>
    %1 = vector.multi_reduction <add>, %0, %cst [3] : vector<2x1x4x256xf32> to vector<2x1x4xf32>
    %cst_3 = arith.constant 3.906250e-03 : f32
    %2 = vector.broadcast %cst_3 : f32 to vector<2x1x4xf32>
    %3 = arith.mulf %1, %2 : vector<2x1x4xf32>
    %c0_4 = arith.constant 0 : index
    %c0_5 = arith.constant 0 : index
    %c0_6 = arith.constant 0 : index
    %4 = vector.load %arg2[%c0_4, %c0_5, %c0_6] : memref<2x4x9xf32, #tpu.memory_space<vmem>>, vector<2x4x9xf32>
    %5 = vector.extract_strided_slice %3 {offsets = [0, 0, 0], sizes = [1, 1, 4], strides = [1, 1, 1]} : vector<2x1x4xf32> to vector<1x1x4xf32>
    %6 = vector.shape_cast %5 : vector<1x1x4xf32> to vector<1x4xf32>
    %7 = vector.extract_strided_slice %4 {offsets = [0, 0, 0], sizes = [1, 4, 9], strides = [1, 1, 1]} : vector<2x4x9xf32> to vector<1x4x9xf32>
    %8 = vector.shape_cast %7 : vector<1x4x9xf32> to vector<4x9xf32>
    %cst_7 = arith.constant dense<0.000000e+00> : vector<1x9xf32>
    %9 = tpu.matmul %6, %8, %cst_7 {dimension_numbers = #tpu.dot_dimension_numbers<[1], [0], [0], [1], [0, 0, 1, 1], [], []>} : vector<1x4xf32>, vector<4x9xf32>, vector<1x9xf32> -> vector<1x9xf32>
    %10 = vector.extract_strided_slice %3 {offsets = [1, 0, 0], sizes = [1, 1, 4], strides = [1, 1, 1]} : vector<2x1x4xf32> to vector<1x1x4xf32>
    %11 = vector.shape_cast %10 : vector<1x1x4xf32> to vector<1x4xf32>
    %12 = vector.extract_strided_slice %4 {offsets = [1, 0, 0], sizes = [1, 4, 9], strides = [1, 1, 1]} : vector<2x4x9xf32> to vector<1x4x9xf32>
    %13 = vector.shape_cast %12 : vector<1x4x9xf32> to vector<4x9xf32>
    %cst_8 = arith.constant dense<0.000000e+00> : vector<1x9xf32>
    %14 = tpu.matmul %11, %13, %cst_8 {dimension_numbers = #tpu.dot_dimension_numbers<[1], [0], [0], [1], [0, 0, 1, 1], [], []>} : vector<1x4xf32>, vector<4x9xf32>, vector<1x9xf32> -> vector<1x9xf32>
    %15 = arith.addf %9, %14 : vector<1x9xf32>
    %c0_9 = arith.constant 0 : index
    %c0_10 = arith.constant 0 : index
    %16 = vector.load %arg3[%c0_9, %c0_10] : memref<1x9xf32, #tpu.memory_space<vmem>>, vector<1x9xf32>
    %17 = arith.addf %15, %16 : vector<1x9xf32>
    %c0_11 = arith.constant 0 : index
    %c0_12 = arith.constant 0 : index
    %18 = vector.load %arg4[%c0_11, %c0_12] : memref<1x9xf32, #tpu.memory_space<vmem>>, vector<1x9xf32>
    tpu.vector_store %arg4[%c0_11, %c0_12], %17 {strides = array<i32>} : memref<1x9xf32, #tpu.memory_space<vmem>>, vector<1x9xf32>,
    return
  }
  func.func @transform_0(%arg0: i32) -> (i32, i32, i32, i32) {
    %c0_i32 = arith.constant 0 : i32
    %c0_i32_0 = arith.constant 0 : i32
    %c0_i32_1 = arith.constant 0 : i32
    %c0_i32_2 = arith.constant 0 : i32
    return %c0_i32, %arg0, %c0_i32_0, %c0_i32_1 : i32, i32, i32, i32
  }
  func.func @transform_1(%arg0: i32) -> (i32, i32, i32) {
    %c0_i32 = arith.constant 0 : i32
    %c0_i32_0 = arith.constant 0 : i32
    %c0_i32_1 = arith.constant 0 : i32
    %c0_i32_2 = arith.constant 0 : i32
    return %c0_i32, %c0_i32_0, %c0_i32_1 : i32, i32, i32
  }
  func.func @transform_2(%arg0: i32) -> (i32, i32) {
    %c0_i32 = arith.constant 0 : i32
    %c0_i32_0 = arith.constant 0 : i32
    %c0_i32_1 = arith.constant 0 : i32
    return %c0_i32, %c0_i32_0 : i32, i32
  }
  func.func @transform_3(%arg0: i32) -> (i32, i32) {
    %c0_i32 = arith.constant 0 : i32
    %c0_i32_0 = arith.constant 0 : i32
    return %arg0, %c0_i32 : i32, i32
  }
}

</mosaic_0001>

<bundles_post_ra>
// kernel: tpu_custom_call.1
= control target key start
LH: loop header
LB: loop body
LE: loop exit
PB: predicated region body
PF: predicated region fallthrough
CT: control target
= control target key end

     0   :  { %8 = vsyncpa [#allocation3], 0  ;;  %s424_s0 = inlined_call_operand.hbm [shape: f32[2,1,4,256], index: 0, kind: input, shape index: {}]   ;;  %s425_s1 = inlined_call_operand.hbm [shape: f32[2,4,9], index: 1, kind: input, shape index: {}]   ;;  %s426_s2 = inlined_call_operand.vmem [shape: f32[1,9], index: 2, kind: input, shape index: {}]   ;;  %s427_s3 = inlined_call_operand.hbm [shape: f32[1,9], index: 3, kind: output, shape index: {}]  }
   0x1   :  { %9 = vsyncpa [#allocation6], 0 }
   0x2   :  { %10 = vsyncpa [#allocation4], 0  ;;  %s350_s12 = smov [#allocation2]   ;;  %s278_s16 = scalar_lea.hbm %s424_s0, 256 }
   0x3   :  { %s16_s13 = sshll.u32 %s350_s12, 4  ;;  %p279_p0 = scmp.ne.s32.totalorder %s424_s0, %s278_s16  ;;  %s17_s13 = int_to_ptr.vmem [resolvable:$true] %s16_s13 }
   0x4   :  { %p282_p1 = scmp.lt.u32.totalorder %s278_s16, %s424_s0 }
   0x6   :  { %p284_p2 = pnand %p282_p1, %p279_p0 }
   0x8   :  { %287 = shalt.err (!%p284_p2)
}
   0x9   :  { %s288_s21 = scalar_lea.vmem %s17_s13, 256  ;;  %p293_p4 = scmp.lt.s32.totalorder %s17_s13, %s17_s13 }
   0xa   :  { %p289_p3 = scmp.ne.s32.totalorder %s17_s13, %s288_s21  ;;  %p294_p5 = scmp.lt.s32.totalorder %s288_s21, %s288_s21 }
   0xc   :  { %p295_p6 = por %p294_p5, %p293_p4 }
   0xe   :  { %p296_p7 = pnand %p295_p6, %p289_p3 }
  0x10   :  { %299 = shalt.err (!%p296_p7)
}
  0x11   :  { %s351_s22 = smov 128   ;;  %s352_s23 = smov 8  }
  0x12   :  { %22 = dma.hbm_to_vmem [thread:$0]  %s424_s0, 256, %s17_s13, [#allocation3], %s351_s22, %s351_s22, %s352_s23  }
  0x13   :  { %s353_s26 = smov [#allocation5]   ;;  %s300_s30 = scalar_lea.hbm %s425_s1, 128 }
  0x14   :  { %s28_s27 = sshll.u32 %s353_s26, 4  ;;  %p301_p8 = scmp.ne.s32.totalorder %s425_s1, %s300_s30  ;;  %s29_s27 = int_to_ptr.vmem [resolvable:$true] %s28_s27 }
  0x15   :  { %p304_p9 = scmp.lt.u32.totalorder %s300_s30, %s425_s1 }
  0x17   :  { %p306_p10 = pnand %p304_p9, %p301_p8 }
  0x19   :  { %309 = shalt.err (!%p306_p10)
}
  0x1a   :  { %s310_s8 = scalar_lea.vmem %s29_s27, 128  ;;  %p315_p12 = scmp.lt.s32.totalorder %s29_s27, %s29_s27 }
  0x1b   :  { %p311_p11 = scmp.ne.s32.totalorder %s29_s27, %s310_s8  ;;  %p316_p13 = scmp.lt.s32.totalorder %s310_s8, %s310_s8 }
  0x1d   :  { %p317_p0 = por %p316_p13, %p315_p12 }
  0x1f   :  { %p318_p1 = pnand %p317_p0, %p311_p11 }
  0x21   :  { %321 = shalt.err (!%p318_p1)
}
  0x22   :  { %s354_s0 = smov 64   ;;  %s355_s9 = smov 4  }
  0x23   :  { %34 = dma.hbm_to_vmem [thread:$0]  %s425_s1, 128, %s29_s27, [#allocation6], %s354_s0, %s354_s0, %s355_s9  }
  0x24   :  { %344 = dma.done.wait [#allocation3], 256  }
  0x25   :  { %345 = vsyncadd [#allocation3], 4294967040 }
  0x26   :  { %346 = dma.done.wait [#allocation6], 128  }
  0x27   :  { %347 = vsyncadd [#allocation6], 4294967168  ;;  %vm51_vm0 = vcmask 1043456   ;;  %v43_v0 = vld [vmem:[#allocation2] sm:$0xff]  ;;  %v44_v1 = vld [vmem:[#allocation2 + $0x8] sm:$0xff]  ;;  %v356_v10 = vmov 0.0   ;;  %v67_v13 = vlaneseq }
  0x28   :  { %v47_v2 = vcombine.high %v43_v0, %v43_v0  ;;  %v52_v3 = vsel %vm51_vm0, %v43_v0, 0.0  ;;  %v48_v4 = vcombine.high %v44_v1, %v44_v1  ;;  %v57_v6 = vsel %vm51_vm0, %v44_v1, 0.0  ;;  %262 = vmatprep.subr.mxu1 %v356_v10  ;;  %v64_v11 = vld [vmem:[#allocation5] sm:$0xf]  ;;  %257 = vmatprep.subr.mxu0 %v356_v10  ;;  %v65_v12 = vld [vmem:[#allocation5 + $0x4] sm:$0xf] }
  0x29   :  { %263 = vmatpush3.msk.msra.mxu1 %vm51_vm0, %v64_v11  ;;  %vm357_vm1 = vmmov 0   ;;  %258 = vmatpush3.msk.msra.mxu0 %vm51_vm0, %v65_v12  ;;  %v68_v14 = vand.u32 127, %v67_v13  ;;  %v70_v15 = vshrl.u32 %v67_v13, 7  ;;  %vm73_vm2 = vcmask 31744   ;;  %v229_v26 = vld [vmem:[%s426_s2] sm:$0x1] }
  0x2a   :  { %v53_v5 = vsel %vm51_vm0, %v47_v2, 0.0  ;;  %v58_v7 = vsel %vm51_vm0, %v48_v4, 0.0  ;;  %264 = vmatprep.mubr.msk.f32.mxu1 %vm357_vm1, %v356_v10  ;;  %259 = vmatprep.mubr.msk.f32.mxu0 %vm357_vm1, %v356_v10  ;;  %s358_s13 = smov [#allocation7]   ;;  %vm231_vm3 = vcmask 65536  }
  0x2b   :  { %v54_v8 = vadd.f32 %v53_v5, %v52_v3  ;;  %v59_v9 = vadd.f32 %v58_v7, %v57_v6  ;;  %v71_v16 = vsub.s32 %v68_v14, %v70_v15  ;;  %s239_s14 = sshll.u32 %s358_s13, 4  ;;  %s240_s14 = int_to_ptr.vmem [resolvable:$true] %s239_s14 }
  0x2c   :  { %s322_s15 = scalar_lea.vmem %s240_s14, 16  ;;  %s326_s16 = scalar_lea.vmem %s240_s14, 32 }
  0x2d   :  { %55 = vadd.xlane.f32.xlu0 %v54_v8  ;;  %p323_p2 = scmp.ne.s32.totalorder %s240_s14, %s322_s15  ;;  %p327_p3 = scmp.lt.s32.totalorder %s240_s14, %s240_s14 }
  0x2e   :  { %p328_p4 = scmp.lt.s32.totalorder %s326_s16, %s322_s15 }
  0x30   :  { %p329_p5 = por %p328_p4, %p327_p3 }
  0x31   :  { %60 = vadd.xlane.f32.xlu0 %v59_v9 }
  0x32   :  { %p330_p6 = pnand %p329_p5, %p323_p2 }
  0xba   :  { %v56_v17 = vpop.xlane.xlu0 %55 }
  0xbb   :  { %v62_v18 = vmul.f32 0.00390625, %v56_v17 }
  0xbd   :  { %v153_v19 = vrot.slane %v62_v18, %v71_v16 }
  0xbe   :  { %v61_v20 = vpop.xlane.xlu0 %60 }
  0xbf   :  { %v63_v21 = vmul.f32 0.00390625, %v61_v20  ;;  %265 = vmatmul.mubr.msk.f32.vlgmr.msra.gmra.mrb[0].mxu1 %vm73_vm2, %v153_v19 }
  0xc1   :  { %v72_v22 = vrot.slane %v63_v21, %v71_v16 }
  0xc3   :  { %260 = vmatmul.mubr.msk.f32.vlgmr.msra.gmra.mrb[0].mxu0 %vm73_vm2, %v72_v22 }
 0x192   :  { %v225_v23 = vpop.f32.mrb[0].mxu1 }
 0x193   :  { %v266_v24 = vpop.f32.mrb[1].mxu1 }
 0x196   :  { %v145_v25 = vpop.f32.mrb[0].mxu0 }
 0x197   :  { %v226_v27 = vadd.f32 %v225_v23, %v145_v25  ;;  %v261_v28 = vpop.f32.mrb[1].mxu0 }
 0x199   :  { %v230_v29 = vadd.f32 %v229_v26, %v226_v27 }
 0x19b   :  { %232 = vst.msk [vmem:[#allocation7] sm:$0x1] %vm231_vm3, %v230_v29 }
 0x19c   :  { %333 = shalt.err (!%p330_p6)
}
 0x19d   :  { %s334_s2 = scalar_lea.hbm %s427_s3, 16 }
 0x19e   :  { %p335_p7 = scmp.ne.s32.totalorder %s427_s3, %s334_s2  ;;  %p338_p8 = scmp.lt.u32.totalorder %s334_s2, %s427_s3 }
 0x1a0   :  { %p340_p9 = pnand %p338_p8, %p335_p7 }
 0x1a2   :  { %343 = shalt.err (!%p340_p9)
}
 0x1a3   :  { %242 = dma.vmem_to_hbm [thread:$0]  %s240_s14, 16, %s427_s3, [#allocation4]  }
 0x1a4   :  { %348 = dma.done.wait [#allocation4], 16  }
 0x1a5   :  { %349 = vsyncadd [#allocation4], 4294967280 }
 0x1a6   :  { %246 = vsyncpa [#allocation3], 1 }
 0x1a7   :  { %247 = vsyncpa [#allocation6], 1 }
 0x1a8   :  { %248 = vsyncpa [#allocation4], 1 }

</bundles_post_ra>
